<compile_context>
chip_gen: v5e
topology: v5e:2x2
jax: 0.10.0
libtpu: 0.0.40
codegen_flags: <defaults>
</compile_context>

<pallas_src>
import math

import jax
import jax.numpy as jnp
from jax.experimental import pallas as pl
from jax.experimental.pallas import tpu as pltpu

_LANE = 128
_SUBLANE = 8
_MAX_BLOCK_BYTES = 2 * 1024 * 1024  # per-block VMEM; 4x (in+out, dbl-buffered) <= 8 MiB


def _copy_kernel(x_ref, o_ref):
    # Pure data movement: the reshape itself is metadata-only in the wrapper.
    o_ref[...] = x_ref[...]


def _resolve_shape(total, args):
    """torch.view-style shape resolution (supports a single -1)."""
    args = tuple(int(a) for a in args)
    if args.count(-1) > 1:
        raise ValueError("only one dimension can be -1")
    if -1 in args:
        known = 1
        for a in args:
            if a != -1:
                known *= a
        if known == 0 or total % known != 0:
            raise ValueError(f"cannot view {total} elements as {args}")
        args = tuple(total // known if a == -1 else a for a in args)
    if math.prod(args) != total:
        raise ValueError(f"cannot view {total} elements as {args}")
    return args


def _choose_tiling(total, itemsize):
    """Pick a lane-dense 2D slab (rows, cols) with cols % 128 == 0 and a
    block_rows satisfying the (8, 128) tiling rule and the VMEM budget."""
    cols = None
    # Prefer wide rows AND rows % 8 == 0 (dense sublanes).
    for c in (2048, 1024, 512, 256, 128):
        if total % c == 0 and (total // c) % _SUBLANE == 0:
            cols = c
            break
    if cols is None:
        for c in (2048, 1024, 512, 256, 128):
            if total % c == 0:
                cols = c
                break
    if cols is None:
        return None  # odd total: single full-extent block fallback
    rows = total // cols

    if rows * cols * itemsize <= _MAX_BLOCK_BYTES or rows < _SUBLANE:
        return rows, cols, rows  # whole slab in one block (== full dims, legal)

    max_block_rows = max(_SUBLANE, _MAX_BLOCK_BYTES // (cols * itemsize))
    block_rows = None
    r = _SUBLANE
    while r <= max_block_rows:
        if rows % r == 0:
            block_rows = r
        r += _SUBLANE
    if block_rows is None:
        block_rows = rows  # full extent is always legal
    return rows, cols, block_rows


def pallas_reshape(x, args):
    total = int(x.size)
    out_dims = _resolve_shape(total, args)
    itemsize = jnp.dtype(x.dtype).itemsize
    cost = pl.CostEstimate(flops=0, transcendentals=0,
                           bytes_accessed=2 * total * itemsize)

    tiling = _choose_tiling(total, itemsize)
    if tiling is None:
        # Tiny / oddly-sized inputs: one block equal to the full array dims.
        flat = x.reshape(1, total)
        out_flat = pl.pallas_call(
            _copy_kernel,
            out_shape=jax.ShapeDtypeStruct((1, total), x.dtype),
            cost_estimate=cost,
        )(flat)
        return out_flat.reshape(out_dims)

    rows, cols, block_rows = tiling
    flat = x.reshape(rows, cols)  # free metadata reshape
    out_flat = pl.pallas_call(
        _copy_kernel,
        out_shape=jax.ShapeDtypeStruct((rows, cols), x.dtype),
        grid=(rows // block_rows,),
        in_specs=[pl.BlockSpec((block_rows, cols), lambda i: (i, 0))],
        out_specs=pl.BlockSpec((block_rows, cols), lambda i: (i, 0)),
        compiler_params=pltpu.CompilerParams(
            dimension_semantics=("parallel",),
            vmem_limit_bytes=48 * 1024 * 1024,  # headroom on v5e/v6e/v7x
        ),
        cost_estimate=cost,
    )(flat)
    return out_flat.reshape(out_dims)  # free metadata reshape


class Reshape:
    """Pallas-backed equivalent of the PyTorch module: forward = x.view(*args)."""

    def __init__(self, *args):
        self.args = args

    def __call__(self, inputs):
        return pallas_reshape(inputs, self.args)


if __name__ == "__main__":
    key = jax.random.PRNGKey(0)
    B, C, H, W = 2, 4, 16, 16
    x = jax.random.normal(key, (B, C, H, W), dtype=jnp.float32)

    # Same semantics as torch: Reshape(2, -1, 64)(x) == x.view(2, -1, 64)
    mod = Reshape(B, -1, 64)
    out = jax.block_until_ready(mod(x))
    ref = jnp.reshape(x, (B, -1, 64))
    assert out.shape == ref.shape, out.shape
    assert jnp.array_equal(out, ref), "mismatch vs reshape reference"

    # Flatten-all case.
    out2 = jax.block_until_ready(Reshape(-1)(x))
    assert jnp.array_equal(out2, x.reshape(-1)), "mismatch vs flatten reference"

    print("KERNEL_OK")
</pallas_src>

<mosaic_0001>
module attributes {stable_mosaic.version = 11 : i64} {
  func.func @_copy_kernel(%arg0: i32, %arg1: memref<8x256xf32, #tpu.memory_space<vmem>>, %arg2: memref<8x256xf32, #tpu.memory_space<vmem>>) attributes {dimension_semantics = [#tpu.dimension_semantics<parallel>], iteration_bounds = array<i64: 1>, scalar_prefetch = 0 : i64, scratch_operands = 0 : i64, tpu.core_type = #tpu.core_type<tc>, window_params = [{transform_indices = @transform_0, window_bounds = array<i64: 8, 256>}, {transform_indices = @transform_1, window_bounds = array<i64: 8, 256>}]} {
    %c0 = arith.constant 0 : index
    %c0_0 = arith.constant 0 : index
    %0 = vector.load %arg1[%c0, %c0_0] : memref<8x256xf32, #tpu.memory_space<vmem>>, vector<8x256xf32>
    %c0_1 = arith.constant 0 : index
    %c0_2 = arith.constant 0 : index
    %1 = vector.load %arg2[%c0_1, %c0_2] : memref<8x256xf32, #tpu.memory_space<vmem>>, vector<8x256xf32>
    tpu.vector_store %arg2[%c0_1, %c0_2], %0 {strides = array<i32>} : memref<8x256xf32, #tpu.memory_space<vmem>>, vector<8x256xf32>,
    return
  }
  func.func @transform_0(%arg0: i32) -> (i32, i32) {
    %c0_i32 = arith.constant 0 : i32
    %c0_i32_0 = arith.constant 0 : i32
    return %arg0, %c0_i32 : i32, i32
  }
  func.func @transform_1(%arg0: i32) -> (i32, i32) {
    %c0_i32 = arith.constant 0 : i32
    %c0_i32_0 = arith.constant 0 : i32
    return %arg0, %c0_i32 : i32, i32
  }
}

</mosaic_0001>

<bundles_post_ra>
// kernel: tpu_custom_call.1
= control target key start
LH: loop header
LB: loop body
LE: loop exit
PB: predicated region body
PF: predicated region fallthrough
CT: control target
= control target key end

     0   :  { %6 = vsyncpa [#allocation3], 0  ;;  %s116_s0 = inlined_call_operand.hbm [shape: f32[8,256], index: 0, kind: input, shape index: {}]   ;;  %s117_s1 = inlined_call_operand.hbm [shape: f32[8,256], index: 1, kind: output, shape index: {}]  }
   0x1   :  { %7 = vsyncpa [#allocation4], 0  ;;  %s13_s8 = sshll.u32 %s116_s0, 4  ;;  %s98_s9 = smov [#allocation2]   ;;  %s14_s8 = int_to_ptr.hbm [resolvable:$true] %s13_s8 }
   0x2   :  { %s15_s10 = sshll.u32 %s98_s9, 4  ;;  %s16_s10 = int_to_ptr.vmem [resolvable:$true] %s15_s10 }
   0x3   :  { %18 = dma.hbm_to_vmem [thread:$0]  %s14_s8, 256, %s16_s10, [#allocation3]  }
   0x4   :  { %94 = dma.done.wait [#allocation3], 256  }
   0x5   :  { %95 = vsyncadd [#allocation3], 4294967040  ;;  %s99_s11 = smov [#allocation5]   ;;  %s34_s15 = sshll.u32 %s117_s1, 4  ;;  %v23_v0 = vld [vmem:[#allocation2] sm:$0xff]  ;;  %v24_v1 = vld [vmem:[#allocation2 + $0x8] sm:$0xff]  ;;  %s35_s15 = int_to_ptr.hbm [resolvable:$true] %s34_s15 }
   0x6   :  { %s32_s12 = sshll.u32 %s99_s11, 4  ;;  %25 = vst [vmem:[#allocation5] sm:$0xff] %v23_v0  ;;  %s33_s12 = int_to_ptr.vmem [resolvable:$true] %s32_s12 }
   0x7   :  { %26 = vst [vmem:[#allocation5 + $0x8] sm:$0xff] %v24_v1 }
   0x8   :  { %37 = dma.vmem_to_hbm [thread:$0]  %s33_s12, 256, %s35_s15, [#allocation4]  }
   0x9   :  { %96 = dma.done.wait [#allocation4], 256  }
   0xa   :  { %97 = vsyncadd [#allocation4], 4294967040 }
   0xb   :  { %42 = vsyncpa [#allocation3], 1 }
   0xc   :  { %43 = vsyncpa [#allocation4], 1 }

</bundles_post_ra>
